<compile_context>
chip_gen: v6e
topology: v6e:2x2x1
jax: 0.10.0
libtpu: 0.0.40
codegen_flags: <defaults>
</compile_context>

<pallas_src>
import math

import jax
import jax.numpy as jnp
from jax.experimental import pallas as pl
from jax.experimental.pallas import tpu as pltpu


def _glu_kernel(a_ref, g_ref, o_ref):
    # Compute in the native dtype: f32 stays f32; bf16 stays bf16 (v6e/v7x VPU
    # and EUP are bf16-native; on v5e Mosaic legalizes via f32 internally).
    o_ref[...] = (a_ref[...] * jax.nn.sigmoid(g_ref[...])).astype(o_ref.dtype)


def _vmem_capacity_bytes() -> int:
    try:
        return int(pltpu.get_tpu_info().vmem_capacity_bytes)
    except Exception:
        return 64 * 1024 * 1024  # conservative default = v7x per-core VMEM


def _pick_lane_width(n: int, sublane: int, cap: int = 8192) -> int:
    """Largest multiple-of-128 divisor L of n with L <= cap, preferring an L
    for which n // L is a multiple of `sublane` (dense sublanes + flexible row
    tiling).  Requires n % 128 == 0."""
    best_any = 0
    lane = (min(cap, n) // 128) * 128
    while lane >= 128:
        if n % lane == 0:
            if best_any == 0:
                best_any = lane
            if (n // lane) % sublane == 0:
                return lane
        lane -= 128
    return best_any


def glu(x: jax.Array, dim: int = 1) -> jax.Array:
    """GLU along `dim` (PyTorch nn.GLU semantics)."""
    dim = dim % x.ndim
    C = x.shape[dim]
    assert C % 2 == 0, "GLU requires an even split dimension"
    Ch = C // 2
    out_logical_shape = x.shape[:dim] + (Ch,) + x.shape[dim + 1:]

    P = math.prod(x.shape[:dim])                 # dims before the split axis
    N = Ch * math.prod(x.shape[dim + 1:])        # one half of a P-slice (contiguous)

    itemsize = jnp.dtype(x.dtype).itemsize
    sublane = max(8, 32 // itemsize)             # 8 f32, 16 bf16, 32 int8

    vmem_cap = _vmem_capacity_bytes()
    # Per-stream tile budget: ~8 MiB on 128 MiB parts (v5e/v6e), ~5.3 MiB on a
    # 64 MiB v7x core -> double-buffered working set 2*3*tile <= ~32-48 MiB.
    tile_budget = max(1 << 20, min(8 << 20, vmem_cap // 12))
    vmem_limit = int(min(vmem_cap * 3 // 4, 6 * tile_budget + (8 << 20)))

    out_elems = P * N
    cost = pl.CostEstimate(
        flops=4 * out_elems,                     # mul + sigmoid's neg/add/div
        transcendentals=out_elems,               # one exp per element
        bytes_accessed=3 * out_elems * itemsize,  # read both halves, write one
    )

    if N % 128 == 0:
        # ---- Main path: lane-dense, contiguous tiles -------------------------
        L = _pick_lane_width(N, sublane)
        R = N // L
        x4 = x.reshape(P, 2, R, L)               # [:, 0] = outputs, [:, 1] = gate

        row_bytes = L * itemsize
        if R * row_bytes <= tile_budget:
            Rb = R                               # whole half of a P-slice per step
        else:
            max_rows = max(1, tile_budget // row_bytes)
            Rb = max(sublane, (max_rows // sublane) * sublane)
            # Prefer an exact divisor (no ragged edge block) when one exists.
            for cand in range(Rb, sublane - 1, -sublane):
                if R % cand == 0:
                    Rb = cand
                    break

        # Extend the block along P when one P-slice is below the tile budget.
        Pb = 1
        if Rb == R:
            Pb = int(min(P, max(1, tile_budget // max(1, R * row_bytes))))

        grid_p = pl.cdiv(P, Pb)
        grid_r = pl.cdiv(R, Rb)
        # v7x megacore: keep >= 2 "parallel" steps when a legal split exists.
        if grid_p * grid_r == 1:
            if P >= 2:
                Pb = (P + 1) // 2
                grid_p = pl.cdiv(P, Pb)
            elif R > sublane:
                Rb = max(sublane, ((R // 2 + sublane - 1) // sublane) * sublane)
                grid_r = pl.cdiv(R, Rb)

        out = pl.pallas_call(
            _glu_kernel,
            out_shape=jax.ShapeDtypeStruct((P, R, L), x.dtype),
            grid=(grid_p, grid_r),
            in_specs=[
                # "outputs" half: block index 0 on the size-2 split axis.
                pl.BlockSpec((Pb, None, Rb, L), lambda p, r: (p, 0, r, 0)),
                # "gate" half: block index 1 (block size 1 -> element offset 1).
                pl.BlockSpec((Pb, None, Rb, L), lambda p, r: (p, 1, r, 0)),
            ],
            out_specs=pl.BlockSpec((Pb, Rb, L), lambda p, r: (p, r, 0)),
            compiler_params=pltpu.CompilerParams(
                dimension_semantics=("parallel", "parallel"),
                vmem_limit_bytes=vmem_limit,
            ),
            cost_estimate=cost,
        )(x4, x4)
        out = out.reshape(out_logical_shape)
    else:
        # ---- Fallback: per-half length has no multiple-of-128 factor ---------
        # The flat half must then be a full-extent lane axis (masked tail
        # stores); tile along P, which becomes the sublane axis.
        # TODO(synk): a P < 8 input with a huge, non-128-divisible half would
        # need in-kernel masking to tile N; not implemented (rare shape).
        x3 = x.reshape(P, 2, N)
        half_bytes = max(1, N * itemsize)
        if P >= 8:
            rows_budget = max(1, tile_budget // half_bytes)
            Pb = min(P, max(8, (rows_budget // 8) * 8))
        else:
            Pb = P
        grid_p = pl.cdiv(P, Pb)
        if grid_p == 1 and Pb >= 16:
            Pb = ((Pb // 2 + 7) // 8) * 8
            grid_p = pl.cdiv(P, Pb)

        out = pl.pallas_call(
            _glu_kernel,
            out_shape=jax.ShapeDtypeStruct((P, N), x.dtype),
            grid=(grid_p,),
            in_specs=[
                pl.BlockSpec((Pb, None, N), lambda p: (p, 0, 0)),
                pl.BlockSpec((Pb, None, N), lambda p: (p, 1, 0)),
            ],
            out_specs=pl.BlockSpec((Pb, N), lambda p: (p, 0)),
            compiler_params=pltpu.CompilerParams(
                dimension_semantics=("parallel",),
                vmem_limit_bytes=vmem_limit,
            ),
            cost_estimate=cost,
        )(x3, x3)
        out = out.reshape(out_logical_shape)

    return out


def _ref_glu(x, dim):
    a, g = jnp.split(x, 2, axis=dim)
    return a * jax.nn.sigmoid(g)


if __name__ == "__main__":
    key = jax.random.PRNGKey(0)
    k1, k2 = jax.random.split(key)

    # Case 1: NCHW, GLU on the channel dim: (2, 4, 16, 16) -> (2, 2, 16, 16).
    x = jax.random.normal(k1, (2, 4, 16, 16), dtype=jnp.float32)
    out = jax.block_until_ready(glu(x, dim=1))
    ref = _ref_glu(x, 1)
    assert out.shape == (2, 2, 16, 16)
    assert jnp.allclose(out, ref, atol=1e-6, rtol=1e-6)

    # Case 2: GLU on the LAST (feature) dim: (2, 8, 256) -> (2, 8, 128).
    x2 = jax.random.normal(k2, (2, 8, 256), dtype=jnp.float32)
    out2 = jax.block_until_ready(glu(x2, dim=-1))
    ref2 = _ref_glu(x2, -1)
    assert out2.shape == (2, 8, 128)
    assert jnp.allclose(out2, ref2, atol=1e-6, rtol=1e-6)

    print("KERNEL_OK")
</pallas_src>

<mosaic_0001>
module attributes {stable_mosaic.version = 11 : i64} {
  func.func @_glu_kernel(%arg0: i32, %arg1: i32, %arg2: memref<1x1x1x512xf32, #tpu.memory_space<vmem>>, %arg3: memref<1x1x1x512xf32, #tpu.memory_space<vmem>>, %arg4: memref<1x1x512xf32, #tpu.memory_space<vmem>>) attributes {dimension_semantics = [#tpu.dimension_semantics<parallel>, #tpu.dimension_semantics<parallel>], iteration_bounds = array<i64: 2, 1>, scalar_prefetch = 0 : i64, scratch_operands = 0 : i64, tpu.core_type = #tpu.core_type<tc>, window_params = [{transform_indices = @transform_0, window_bounds = array<i64: 1, 1, 1, 512>}, {transform_indices = @transform_1, window_bounds = array<i64: 1, 1, 1, 512>}, {transform_indices = @transform_2, window_bounds = array<i64: 1, 1, 512>}]} {
    %c0 = arith.constant 0 : index
    %c0_0 = arith.constant 0 : index
    %c0_1 = arith.constant 0 : index
    %c0_2 = arith.constant 0 : index
    %0 = vector.load %arg2[%c0, %c0_0, %c0_1, %c0_2] : memref<1x1x1x512xf32, #tpu.memory_space<vmem>>, vector<1x1x1x512xf32>
    %1 = vector.shape_cast %0 : vector<1x1x1x512xf32> to vector<1x1x512xf32>
    %c0_3 = arith.constant 0 : index
    %c0_4 = arith.constant 0 : index
    %c0_5 = arith.constant 0 : index
    %c0_6 = arith.constant 0 : index
    %2 = vector.load %arg3[%c0_3, %c0_4, %c0_5, %c0_6] : memref<1x1x1x512xf32, #tpu.memory_space<vmem>>, vector<1x1x1x512xf32>
    %3 = vector.shape_cast %2 : vector<1x1x1x512xf32> to vector<1x1x512xf32>
    %4 = arith.negf %3 : vector<1x1x512xf32>
    %5 = math.exp %4 : vector<1x1x512xf32>
    %cst = arith.constant 1.000000e+00 : f32
    %6 = vector.broadcast %cst : f32 to vector<1x1x512xf32>
    %7 = arith.addf %6, %5 : vector<1x1x512xf32>
    %8 = arith.divf %6, %7 : vector<1x1x512xf32>
    %9 = arith.mulf %1, %8 : vector<1x1x512xf32>
    %c0_7 = arith.constant 0 : index
    %c0_8 = arith.constant 0 : index
    %c0_9 = arith.constant 0 : index
    %10 = vector.load %arg4[%c0_7, %c0_8, %c0_9] : memref<1x1x512xf32, #tpu.memory_space<vmem>>, vector<1x1x512xf32>
    tpu.vector_store %arg4[%c0_7, %c0_8, %c0_9], %9 {strides = array<i32>} : memref<1x1x512xf32, #tpu.memory_space<vmem>>, vector<1x1x512xf32>,
    return
  }
  func.func @transform_0(%arg0: i32, %arg1: i32) -> (i32, i32, i32, i32) {
    %c0_i32 = arith.constant 0 : i32
    %c0_i32_0 = arith.constant 0 : i32
    %c0_i32_1 = arith.constant 0 : i32
    return %arg0, %c0_i32, %arg1, %c0_i32_0 : i32, i32, i32, i32
  }
  func.func @transform_1(%arg0: i32, %arg1: i32) -> (i32, i32, i32, i32) {
    %c1_i32 = arith.constant 1 : i32
    %c0_i32 = arith.constant 0 : i32
    %c0_i32_0 = arith.constant 0 : i32
    return %arg0, %c1_i32, %arg1, %c0_i32 : i32, i32, i32, i32
  }
  func.func @transform_2(%arg0: i32, %arg1: i32) -> (i32, i32, i32) {
    %c0_i32 = arith.constant 0 : i32
    %c0_i32_0 = arith.constant 0 : i32
    return %arg0, %arg1, %c0_i32 : i32, i32, i32
  }
}

</mosaic_0001>

<bundles_post_ra>
// kernel: tpu_custom_call.1
= control target key start
LH: loop header
LB: loop body
LE: loop exit
PB: predicated region body
PF: predicated region fallthrough
CT: control target
= control target key end

     0   :  { %7 = vsyncpa [#allocation3], 0  ;;  %s779_s0 = inlined_call_operand.hbm [shape: f32[2,2,1,512], index: 0, kind: input, shape index: {}]   ;;  %s780_s1 = inlined_call_operand.hbm [shape: f32[2,2,1,512], index: 1, kind: input, shape index: {}]   ;;  %s781_s2 = inlined_call_operand.hbm [shape: f32[2,1,512], index: 2, kind: output, shape index: {}]  }
   0x1   :  { %9 = vsyncpa [#allocation3 + $0x1], 0 }
   0x2   :  { %10 = vsyncpa [#allocation6], 0 }
   0x3   :  { %12 = vsyncpa [#allocation6 + $0x1], 0 }
   0x4   :  { %13 = vsyncpa [#allocation4], 0 }
   0x5   :  { %15 = vsyncpa [#allocation4 + $0x1], 0  ;;  %s618_s9 = smov 0   ;;  %s620_s10 = smov 0  }
   0x6   :  { %s622_s11 = smov 0   ;;  %s624_s12 = smov 0  }
   0x7   :  { %s626_s13 = smov 0   ;;  %s628_s14 = smov 0  }
   0x8 LB: > { %s363_s15 = sadd.s32 4294967295, %s598_s14   ;;  %s364_s16 = sadd.s32 4294967294, %s598_s14   ;;  %s598_s14 = sphi %s628_s14, %s21_s14   ;;  %s594_s13 = sphi %s626_s13, %s793_s13   ;;  %s590_s12 = sphi %s624_s12, %s792_s12   ;;  %s586_s11 = sphi %s622_s11, %s791_s11   ;;  %s582_s10 = sphi %s620_s10, %s790_s10   ;;  %s578_s9 = sphi %s618_s9, %s789_s9  }
   0x9   : > { %s33_s17 = sadd.s32 1, %s594_s13  ;;  %s42_s18 = sadd.s32 1, %s586_s11 }
   0xa   : > { %p35_p0 = scmp.ge.s32.totalorder %s33_s17, 2  ;;  %p49_p1 = scmp.ne.s32.totalorder %s586_s11, %s582_s10 }
   0xb   : > { %p50_p2 = scmp.eq.s32.totalorder %s598_s14, 0  ;;  %p55_p3 = scmp.ne.s32.totalorder %s582_s10, %s578_s9 }
   0xc   : > { %s795_s17 = smov (%p35_p0, %s33_s17), 0  ;;  %p56_p5 = scmp.eq.s32.totalorder %s363_s15, 0 }
   0xd   : > { %p659_p4 = por %p50_p2, %p49_p1  ;;  %s37_s20 = ssub.s32 %s594_s13, %s795_s17 }
   0xe   : > { %p109_p6 = scmp.eq.s32.totalorder %s363_s15, 1  ;;  %p40_p7 = scmp.eq.s32.totalorder %s37_s20, 0 }
   0xf   : > { %p665_p8 = por %p56_p5, %p55_p3  ;;  %p115_p10 = scmp.eq.s32.totalorder %s364_s16, 1 }
  0x10   : > { %p669_p9 = por %p109_p6, %p49_p1  ;;  %p403_p13 = scmp.lt.s32.totalorder %s598_s14, 2 }
  0x11   : > { %s674_s23 = scalar_select %p40_p7, %s586_s11, %s42_s18  }
  0x12   : > { %p676_p11 = por %p115_p10, %p55_p3  ;;  %s683_s25 = sand.u32 1, %s586_s11  }
  0x13   : > { %s367_s26 = sshll.u32 %s683_s25, 2  ;;  %s383_s27 = sshll.u32 %s594_s13, 7 }
  0x14   : > { %s147_s30 = scalar_lea.hbm %s779_s0, %s383_s27  ;;  %s139_s3 = scalar_lea.vmem [#allocation2], %s367_s26 }
  0x15   : > { %s149_s4 = sshll.u32 %s139_s3, 4  ;;  %p692_p0 = pnand %p403_p13, %p659_p4  ;;  %s150_s4 = int_to_ptr.vmem [resolvable:$true] %s149_s4 }
  0x16   : > { %p373_p1 = scmp.ge.s32.totalorder %s598_s14, 1  ;;  %p176_p2 = scmp.lt.s32.totalorder %s598_s14, 3 }
  0x17   : > { %s136_s6 = scalar_lea.sflag [#allocation3], %s683_s25  ;;  %p459_p3 = pneg %p692_p0 }
  0x18   : > { %s470_s7 = scalar_lea.vmem %s150_s4, 64  ;;  %s600_s8 = smov [#allocation2]  }
  0x19   : > { %p471_p5 = scmp.ne.s32.totalorder %s150_s4, %s470_s7  ;;  %s475_s15 = sshll.u32 %s600_s8, 4  ;;  %s476_s15 = int_to_ptr.vmem [resolvable:$false] %s475_s15 }
  0x1a   : > { %s477_s16 = scalar_lea.vmem %s476_s15, 128  ;;  %p478_p4 = scmp.lt.s32.totalorder %s150_s4, %s476_s15 }
  0x1b   : > { %p473_p6 = pnand %p471_p5, %p459_p3  ;;  %p479_p10 = scmp.lt.s32.totalorder %s477_s16, %s470_s7 }
  0x1d   : > { %p474_p7 = pneg %p473_p6  ;;  %p480_p13 = por %p479_p10, %p478_p4 }
  0x1f   : > { %p481_p12 = pnand %p480_p13, %p474_p7 }
  0x21   : > { %484 = shalt.err (!%p481_p12)
}
  0x22   : > { %395 = dma.hbm_to_vmem [thread:$0]  (!%p692_p0), %s147_s30, 64, %s150_s4, %s136_s6  }
  0x23   : > { %p710_p5 = pnand %p373_p1, %p176_p2  ;;  %s294_s28 = scalar_lea.hbm %s780_s1, %s383_s27 }
  0x24   : > { %s160_s29 = scalar_lea.vmem [#allocation5], %s367_s26  ;;  %s295_s7 = scalar_lea.hbm %s294_s28, 64 }
  0x25   : > { %s171_s3 = sshll.u32 %s160_s29, 4  ;;  %s157_s8 = scalar_lea.sflag [#allocation6], %s683_s25  ;;  %s172_s3 = int_to_ptr.vmem [resolvable:$true] %s171_s3 }
  0x26   : > { %s498_s15 = scalar_lea.vmem %s172_s3, 64  ;;  %s601_s30 = smov [#allocation5]  }
  0x27   : > { %p499_p12 = scmp.ne.s32.totalorder %s172_s3, %s498_s15  ;;  %s503_s4 = sshll.u32 %s601_s30, 4  ;;  %s504_s4 = int_to_ptr.vmem [resolvable:$false] %s503_s4 }
  0x28   : > { %s505_s6 = scalar_lea.vmem %s504_s4, 128  ;;  %p506_p1 = scmp.lt.s32.totalorder %s172_s3, %s504_s4 }
  0x29   : > { %p501_p6 = pnand %p499_p12, %p459_p3  ;;  %p507_p2 = scmp.lt.s32.totalorder %s505_s6, %s498_s15 }
  0x2b   : > { %p502_p7 = pneg %p501_p6  ;;  %p508_p4 = por %p507_p2, %p506_p1 }
  0x2d   : > { %p509_p10 = pnand %p508_p4, %p502_p7 }
  0x2f   : > { %512 = shalt.err (!%p509_p10)
}
  0x30   : > { %398 = dma.hbm_to_vmem [thread:$0]  (!%p692_p0), %s295_s7, 64, %s172_s3, %s157_s8  }
  0x31   : > { %180 = sbr.rel (%p710_p5) target bundleno = 105 (0x69), region = 28  ;;  %s726_s25 = sand.u32 (!%p710_p5), 1, %s582_s10  }
  0x32   : > { %s374_s26 = sshll.u32 (!%p710_p5), %s726_s25, 2  ;;  %s183_s27 = scalar_lea.sflag (!%p710_p5), [#allocation3], %s726_s25 }
  0x33   : > { %s186_s16 = scalar_lea.vmem (!%p710_p5), [#allocation2], %s374_s26 }
  0x36   : > { %565 = dma.done.wait (%p665_p8), %s183_s27, 64  }
  0x37   : > { %567 = vsyncadd (%p665_p8), %s183_s27, 4294967232  ;;  %s192_s5 = scalar_lea.sflag [#allocation6], %s726_s25  ;;  %s195_s19 = scalar_lea.vmem [#allocation5], %s374_s26 }
  0x38   : > { %569 = dma.done.wait (%p665_p8), %s192_s5, 64  }
  0x39   : > { %571 = vsyncadd (%p665_p8), %s192_s5, 4294967232  ;;  %v222_v0 = vld [vmem:[%s195_s19] sm:$0xf]  ;;  %v230_v4 = vlaneseq  ;;  %v221_v5 = vld [vmem:[%s186_s16] sm:$0xf]  ;;  %s220_s18 = scalar_lea.vmem [#allocation7], %s374_s26 }
  0x3a   : > { %v377_v1 = vmul.f32 -1.442695, %v222_v0  ;;  %s252_s20 = sshll.u32 %s220_s18, 4  ;;  %s385_s28 = sshll.u32 %s590_s12, 6  ;;  %s253_s20 = int_to_ptr.vmem [resolvable:$true] %s252_s20 }
  0x3b   : > { %vm232_vm0 = vcmp.lt.s32.totalorder %v230_v4, 512  ;;  %s250_s3 = scalar_lea.hbm %s781_s2, %s385_s28  ;;  %s236_s7 = scalar_lea.sflag [#allocation4], %s726_s25 }
  0x3c   : > { %453 = vpow2.f32 %v377_v1  ;;  %s514_s8 = scalar_lea.vmem %s253_s20, 64  ;;  %s602_s15 = smov [#allocation7]  }
  0x3d   : > { %p515_p8 = scmp.ne.s32.totalorder %s253_s20, %s514_s8  ;;  %s518_s30 = sshll.u32 %s602_s15, 4  ;;  %s519_s30 = int_to_ptr.vmem [resolvable:$false] %s518_s30 }
  0x3e   : > { %s520_s4 = scalar_lea.vmem %s519_s30, 128  ;;  %p521_p13 = scmp.lt.s32.totalorder %s253_s20, %s519_s30 }
  0x3f   : > { %p516_p0 = pnand %p515_p8, %p669_p9  ;;  %p522_p5 = scmp.lt.s32.totalorder %s520_s4, %s514_s8 }
  0x41   : > { %p517_p3 = pneg %p516_p0  ;;  %p523_p12 = por %p522_p5, %p521_p13 }
  0x43   : > { %p524_p6 = pnand %p523_p12, %p517_p3 }
  0x49   : > { %v454_v2 = vpop.eup %453 }
  0x4a   : > { %v226_v3 = vadd.f32 1.0, %v454_v2 }
  0x4c   : > { %455 = vrcp.f32 %v226_v3 }
  0x59   : > { %v456_v6 = vpop.eup %455 }
  0x5a   : > { %v229_v7 = vmul.f32 %v456_v6, %v221_v5 }
  0x5c   : > { %234 = vst.msk [vmem:[%s220_s18] sm:$0xf] %vm232_vm0, %v229_v7 }
  0x5d   : > { %527 = shalt.err (!%p524_p6)
}
  0x5e   : > { %s528_s12 = scalar_lea.hbm %s250_s3, 64  ;;  %s532_s26 = scalar_lea.hbm %s781_s2, 128 }
  0x5f   : > { %p529_p7 = scmp.ne.s32.totalorder %s250_s3, %s528_s12  ;;  %p533_p4 = scmp.lt.s32.totalorder %s250_s3, %s781_s2 }
  0x60   : > { %p534_p10 = scmp.lt.s32.totalorder %s532_s26, %s528_s12 }
  0x61   : > { %p530_p1 = pnand %p529_p7, %p669_p9 }
  0x62   : > { %p535_p8 = por %p534_p10, %p533_p4 }
  0x63   : > { %p531_p2 = pneg %p530_p1 }
  0x65   : > { %p536_p0 = pnand %p535_p8, %p531_p2 }
  0x67   : > { %539 = shalt.err (!%p536_p0)
}
  0x68   : > { %390 = dma.vmem_to_hbm [thread:$0]  (%p669_p9), %s253_s20, 64, %s250_s3, %s236_s7  }
  0x69 PF: > { %s264_s5 = sand.u32 1, %s578_s9   ;;  %p788_p3 = scmp.ge.s32.totalorder %s598_s14, 2 }
  0x6a   : > { %s265_s19 = scalar_lea.sflag [#allocation4], %s264_s5 }
  0x6b   : > { %p400_p13 = pnand %p788_p3, %p676_p11 }
  0x6d   : > { %p401_p5 = pneg %p400_p13 }
  0x6f   : > { %573 = dma.done.wait (%p401_p5), %s265_s19, 64  }
  0x70   : > { %575 = vsyncadd (%p401_p5), %s265_s19, 4294967232  ;;  %s21_s14 = sadd.s32 1, %s598_s14   ;;  %s789_s9 = smov %s582_s10 }
  0x71   : > { %p18_p12 = scmp.ge.s32.totalorder %s21_s14, 4   ;;  %s790_s10 = smov %s586_s11 }
  0x72   : > { %s791_s11 = smov %s674_s23  ;;  %s792_s12 = smov %s594_s13 }
  0x73   : > { %s793_s13 = smov %s795_s17  ;;  %20 = sbr.rel (!%p18_p12) target bundleno = 8 (0x8), region = 86 }
  0x78   :  { %270 = vsyncpa [#allocation3], 1 }
  0x79   :  { %272 = vsyncpa [#allocation3 + $0x1], 1 }
  0x7a   :  { %273 = vsyncpa [#allocation6], 1 }
  0x7b   :  { %275 = vsyncpa [#allocation6 + $0x1], 1 }
  0x7c   :  { %276 = vsyncpa [#allocation4], 1 }
  0x7d   :  { %278 = vsyncpa [#allocation4 + $0x1], 1 }

</bundles_post_ra>
